<compile_context>
chip_gen: v5e
topology: v5e:2x2
jax: 0.10.0
libtpu: 0.0.40
codegen_flags: <defaults>
</compile_context>

<pallas_src>
import functools

import jax
import jax.numpy as jnp
from jax.experimental import pallas as pl
from jax.experimental.pallas import tpu as pltpu

_LANE = 128
_SUBLANE = 8


def _round_up(x: int, m: int) -> int:
    return (x + m - 1) // m * m


@functools.lru_cache(maxsize=1)
def _vmem_budget_bytes() -> int:
    """Generation-aware VMEM budget (~85% of physical per-core VMEM)."""
    try:
        cap = int(pltpu.get_tpu_info().vmem_capacity_bytes)
    except Exception:
        cap = 64 << 20  # conservative (v7x-sized) fallback
    return max(32 << 20, int(cap * 0.85))


def _pick_hidden_tile(In_p: int, H_p: int, Out_p: int, esize: int, budget: int) -> int:
    """Largest multiple of 128 that divides H_p whose double-buffered W1/W2 tiles
    fit inside ~half of the VMEM budget."""
    m = H_p // _LANE
    best = _LANE
    for d in range(1, m + 1):
        if m % d:
            continue
        th = d * _LANE
        if 2 * (In_p * th + th * Out_p) * esize <= budget // 2:
            best = th
    return best


# --------------------------------------------------------------------------- kernels
def _mlp_kernel_resident(x_ref, w1_ref, b1_ref, w2_ref, b2_ref, o_ref):
    # fc1: (TB, In_p) @ (In_p, H_p) with f32 accumulation on the MXU.
    h = jnp.dot(x_ref[...], w1_ref[...], preferred_element_type=jnp.float32)
    # Bias broadcast + sigmoid (EUP) in f32.
    h = jax.nn.sigmoid(h + b1_ref[...])
    # fc2: cast h to the weight dtype so a bf16 weight path feeds matched operands.
    y = jnp.dot(h.astype(w2_ref.dtype), w2_ref[...],
                preferred_element_type=jnp.float32)
    o_ref[...] = (y + b2_ref[...]).astype(o_ref.dtype)


def _mlp_kernel_htiled(x_ref, w1_ref, b1_ref, w2_ref, b2_ref, o_ref, acc_ref):
    # Reduction over hidden tiles: acc += sigmoid(x @ W1[:, j] + b1[j]) @ W2[j, :]
    j = pl.program_id(1)

    @pl.when(j == 0)
    def _():
        acc_ref[...] = jnp.zeros_like(acc_ref)

    h = jnp.dot(x_ref[...], w1_ref[...], preferred_element_type=jnp.float32)
    h = jax.nn.sigmoid(h + b1_ref[...])
    acc_ref[...] += jnp.dot(h.astype(w2_ref.dtype), w2_ref[...],
                            preferred_element_type=jnp.float32)

    @pl.when(j == pl.num_programs(1) - 1)
    def _():
        o_ref[...] = (acc_ref[...] + b2_ref[...]).astype(o_ref.dtype)


# --------------------------------------------------------------------------- forward
@functools.partial(jax.jit,
                   static_argnames=("out_features", "block_batch", "block_hidden"))
def _mlp_forward(x, w1_p, b1_p, w2_p, b2_p, *, out_features,
                 block_batch=512, block_hidden=None):
    B, In = x.shape
    In_p, H_p = w1_p.shape
    H_p2, Out_p = w2_p.shape
    assert H_p == H_p2 and In <= In_p and out_features <= Out_p

    out_dtype = x.dtype
    cdtype = w1_p.dtype
    esize = jnp.dtype(cdtype).itemsize
    out_isize = jnp.dtype(out_dtype).itemsize

    budget = _vmem_budget_bytes()
    slack = 4 << 20

    # ---- batch tile: large, multiple of 8, but keep >=2 grid steps so both
    # TensorCores on a multi-core chip (v7x) get work.
    tb = min(int(block_batch), _round_up(max(-(-B // 2), 1), _SUBLANE))
    tb = max(tb, _SUBLANE)

    # ---- resident-weight path vs hidden-(reduction)-tiled fallback
    resident_weight_bytes = (In_p * H_p + H_p * Out_p) * esize + (H_p + Out_p) * 4
    use_resident = (block_hidden is None) and (resident_weight_bytes <= budget // 2)

    if use_resident:
        th = H_p
        fixed = resident_weight_bytes                        # Buffered(1): 1x weights
        per_row = (2 * In_p * esize                          # x tile (2 bufs)
                   + 2 * Out_p * out_isize                   # out tile (2 bufs)
                   + H_p * 4 + H_p * esize                   # f32 hidden + cast copy
                   + Out_p * 4)                              # f32 y tile
    else:
        if block_hidden is not None:
            th = int(block_hidden)
            assert th % _LANE == 0 and H_p % th == 0, "block_hidden must divide H_p"
        else:
            th = _pick_hidden_tile(In_p, H_p, Out_p, esize, budget)
        fixed = (2 * (In_p * th + th * Out_p) * esize        # W1/W2 tiles (2 bufs)
                 + 2 * th * 4 + Out_p * 4)                   # b1 tiles + b2
        per_row = (2 * In_p * esize
                   + 2 * Out_p * out_isize
                   + th * 4 + th * esize
                   + Out_p * 4                               # f32 y tile
                   + Out_p * 4)                              # f32 accumulator scratch

    # Size the batch tile down to the true VMEM limit (with slack).
    avail = budget - fixed - slack
    if avail >= per_row * _SUBLANE:
        tb = min(tb, max(_SUBLANE, (avail // per_row) // _SUBLANE * _SUBLANE))
    else:
        tb = _SUBLANE

    B_p = _round_up(B, tb)
    grid_b = B_p // tb

    est = fixed + tb * per_row + slack
    vmem_limit = int(min(max(est, 32 << 20), budget))

    # ---- x: no-pad fast path when already lane-aligned and tile-divisible.
    if In == In_p and B == B_p:
        x_p = x.astype(cdtype)
    else:
        x_p = jnp.zeros((B_p, In_p), cdtype).at[:B, :In].set(x.astype(cdtype))

    resident_one = functools.partial(pl.Buffered, 1)

    if use_resident:
        out_p = pl.pallas_call(
            _mlp_kernel_resident,
            out_shape=jax.ShapeDtypeStruct((B_p, Out_p), out_dtype),
            grid_spec=pltpu.PrefetchScalarGridSpec(
                num_scalar_prefetch=0,
                grid=(grid_b,),
                in_specs=[
                    pl.BlockSpec((tb, In_p), lambda i: (i, 0)),       # x: batch-tiled
                    pl.BlockSpec((In_p, H_p), lambda i: (0, 0),
                                 pipeline_mode=resident_one()),       # W1 resident, 1 buf
                    pl.BlockSpec((1, H_p), lambda i: (0, 0),
                                 pipeline_mode=resident_one()),       # b1 resident, 1 buf
                    pl.BlockSpec((H_p, Out_p), lambda i: (0, 0),
                                 pipeline_mode=resident_one()),       # W2 resident, 1 buf
                    pl.BlockSpec((1, Out_p), lambda i: (0, 0),
                                 pipeline_mode=resident_one()),       # b2 resident, 1 buf
                ],
                out_specs=pl.BlockSpec((tb, Out_p), lambda i: (i, 0)),
            ),
            compiler_params=pltpu.CompilerParams(
                dimension_semantics=("parallel",),
                vmem_limit_bytes=vmem_limit,
            ),
        )(x_p, w1_p, b1_p, w2_p, b2_p)
    else:
        grid_h = H_p // th
        out_p = pl.pallas_call(
            _mlp_kernel_htiled,
            out_shape=jax.ShapeDtypeStruct((B_p, Out_p), out_dtype),
            grid_spec=pltpu.PrefetchScalarGridSpec(
                num_scalar_prefetch=0,
                grid=(grid_b, grid_h),
                in_specs=[
                    pl.BlockSpec((tb, In_p), lambda i, j: (i, 0)),    # x
                    pl.BlockSpec((In_p, th), lambda i, j: (0, j)),    # W1 hidden tile
                    pl.BlockSpec((1, th), lambda i, j: (0, j)),       # b1 hidden tile
                    pl.BlockSpec((th, Out_p), lambda i, j: (j, 0)),   # W2 hidden tile
                    pl.BlockSpec((1, Out_p), lambda i, j: (0, 0),
                                 pipeline_mode=resident_one()),       # b2 resident
                ],
                out_specs=pl.BlockSpec((tb, Out_p), lambda i, j: (i, 0)),
                scratch_shapes=[pltpu.VMEM((tb, Out_p), jnp.float32)],
            ),
            compiler_params=pltpu.CompilerParams(
                dimension_semantics=("parallel", "arbitrary"),
                vmem_limit_bytes=vmem_limit,
            ),
        )(x_p, w1_p, b1_p, w2_p, b2_p)

    # No-slice fast path when nothing was padded.
    if B_p == B and Out_p == out_features:
        return out_p
    return out_p[:B, :out_features]


# --------------------------------------------------------------------------- wrapper
class PallasMLP:
    """fc1 -> Sigmoid -> fc2.  Parameters are padded to lane-dense shapes ONCE here
    and cached, so the per-call path only streams x / out."""

    def __init__(self, w1, b1, w2, b2, *, compute_dtype=None,
                 block_batch=512, block_hidden=None):
        In, H = w1.shape
        H2, Out = w2.shape
        assert H == H2, "fc1/fc2 shapes inconsistent"
        self.in_features, self.hidden, self.out_features = In, H, Out
        self.block_batch = int(block_batch)
        self.block_hidden = block_hidden
        cdtype = jnp.dtype(compute_dtype) if compute_dtype is not None else jnp.dtype(w1.dtype)
        self.compute_dtype = cdtype

        In_p, H_p, Out_p = (_round_up(d, _LANE) for d in (In, H, Out))
        self.w1_p = jnp.zeros((In_p, H_p), cdtype).at[:In, :H].set(w1.astype(cdtype))
        self.w2_p = jnp.zeros((H_p, Out_p), cdtype).at[:H, :Out].set(w2.astype(cdtype))
        self.b1_p = jnp.zeros((1, H_p), jnp.float32).at[:, :H].set(
            jnp.reshape(b1, (1, -1)).astype(jnp.float32))
        self.b2_p = jnp.zeros((1, Out_p), jnp.float32).at[:, :Out].set(
            jnp.reshape(b2, (1, -1)).astype(jnp.float32))

    def __call__(self, x):
        return _mlp_forward(
            x, self.w1_p, self.b1_p, self.w2_p, self.b2_p,
            out_features=self.out_features,
            block_batch=self.block_batch,
            block_hidden=self.block_hidden,
        )


def reference_forward(x, w1, b1, w2, b2):
    h = jax.nn.sigmoid(x @ w1 + b1.reshape(1, -1))
    return h @ w2 + b2.reshape(1, -1)


if __name__ == "__main__":
    key = jax.random.PRNGKey(0)
    kx, kw1, kb1, kw2, kb2, kx2, kw3, kb3, kw4, kb4 = jax.random.split(key, 10)

    # --- Test 1: small shapes matching the module (resident-weight path, f32) ---
    batch, input_size, hidden_size, output_size = 8, 32, 64, 16
    x = jax.random.normal(kx, (batch, input_size), dtype=jnp.float32)
    # PyTorch Linear stores weight as (out, in); we store (in, out).
    w1 = jax.random.normal(kw1, (input_size, hidden_size), dtype=jnp.float32) * 0.1
    b1 = jax.random.normal(kb1, (hidden_size,), dtype=jnp.float32) * 0.1
    w2 = jax.random.normal(kw2, (hidden_size, output_size), dtype=jnp.float32) * 0.1
    b2 = jax.random.normal(kb2, (output_size,), dtype=jnp.float32) * 0.1

    model = PallasMLP(w1, b1, w2, b2)                      # pads/caches weights once
    out = jax.block_until_ready(model(x))
    ref = reference_forward(x, w1, b1, w2, b2)
    assert out.shape == (batch, output_size)
    assert jnp.allclose(out, ref, atol=1e-5, rtol=1e-5), "f32 resident path mismatch"

    # --- Test 2: bf16 operand path (f32 accumulation), relaxed tolerance ---------
    model_bf16 = PallasMLP(w1, b1, w2, b2, compute_dtype=jnp.bfloat16)
    out_bf16 = jax.block_until_ready(model_bf16(x))
    assert jnp.allclose(out_bf16, ref, atol=5e-2, rtol=5e-2), "bf16 path mismatch"

    # --- Test 3: lane-aligned shapes exercising the hidden-tiled fallback and the
    #             no-pad / no-slice fast path --------------------------------------
    B2, In2, H2, Out2 = 16, 128, 256, 128
    x2 = jax.random.normal(kx2, (B2, In2), dtype=jnp.float32)
    w3 = jax.random.normal(kw3, (In2, H2), dtype=jnp.float32) * 0.05
    b3 = jax.random.normal(kb3, (H2,), dtype=jnp.float32) * 0.05
    w4 = jax.random.normal(kw4, (H2, Out2), dtype=jnp.float32) * 0.05
    b4 = jax.random.normal(kb4, (Out2,), dtype=jnp.float32) * 0.05

    model_tiled = PallasMLP(w3, b3, w4, b4, block_batch=8, block_hidden=128)
    out2 = jax.block_until_ready(model_tiled(x2))
    ref2 = reference_forward(x2, w3, b3, w4, b4)
    assert out2.shape == (B2, Out2)
    assert jnp.allclose(out2, ref2, atol=2e-3, rtol=2e-3), "hidden-tiled path mismatch"

    print("KERNEL_OK")
</pallas_src>

<mosaic_0001>
module attributes {stable_mosaic.version = 11 : i64} {
  func.func @_mlp_kernel_resident(%arg0: i32, %arg1: memref<8x128xf32, #tpu.memory_space<vmem>>, %arg2: memref<128x128xf32, #tpu.memory_space<vmem>>, %arg3: memref<1x128xf32, #tpu.memory_space<vmem>>, %arg4: memref<128x128xf32, #tpu.memory_space<vmem>>, %arg5: memref<1x128xf32, #tpu.memory_space<vmem>>, %arg6: memref<8x128xf32, #tpu.memory_space<vmem>>) attributes {dimension_semantics = [#tpu.dimension_semantics<parallel>], iteration_bounds = array<i64: 1>, scalar_prefetch = 0 : i64, scratch_operands = 0 : i64, tpu.core_type = #tpu.core_type<tc>, window_params = [{transform_indices = @transform_0, window_bounds = array<i64: 8, 128>}, {pipeline_mode = #tpu.pipeline_mode<synchronous>, transform_indices = @transform_1, window_bounds = array<i64: 128, 128>}, {pipeline_mode = #tpu.pipeline_mode<synchronous>, transform_indices = @transform_2, window_bounds = array<i64: 1, 128>}, {pipeline_mode = #tpu.pipeline_mode<synchronous>, transform_indices = @transform_3, window_bounds = array<i64: 128, 128>}, {pipeline_mode = #tpu.pipeline_mode<synchronous>, transform_indices = @transform_4, window_bounds = array<i64: 1, 128>}, {transform_indices = @transform_5, window_bounds = array<i64: 8, 128>}]} {
    %c0 = arith.constant 0 : index
    %c0_0 = arith.constant 0 : index
    %0 = vector.load %arg1[%c0, %c0_0] : memref<8x128xf32, #tpu.memory_space<vmem>>, vector<8x128xf32>
    %c0_1 = arith.constant 0 : index
    %c0_2 = arith.constant 0 : index
    %1 = vector.load %arg2[%c0_1, %c0_2] : memref<128x128xf32, #tpu.memory_space<vmem>>, vector<128x128xf32>
    %cst = arith.constant dense<0.000000e+00> : vector<8x128xf32>
    %2 = tpu.matmul %0, %1, %cst {dimension_numbers = #tpu.dot_dimension_numbers<[1], [0], [0], [1], [0, 0, 1, 1], [], []>} : vector<8x128xf32>, vector<128x128xf32>, vector<8x128xf32> -> vector<8x128xf32>
    %c0_3 = arith.constant 0 : index
    %c0_4 = arith.constant 0 : index
    %3 = vector.load %arg3[%c0_3, %c0_4] : memref<1x128xf32, #tpu.memory_space<vmem>>, vector<1x128xf32>
    %4 = vector.broadcast %3 : vector<1x128xf32> to vector<8x128xf32>
    %5 = arith.addf %2, %4 : vector<8x128xf32>
    %6 = arith.negf %5 : vector<8x128xf32>
    %7 = math.exp %6 : vector<8x128xf32>
    %cst_5 = arith.constant 1.000000e+00 : f32
    %8 = vector.broadcast %cst_5 : f32 to vector<8x128xf32>
    %9 = arith.addf %8, %7 : vector<8x128xf32>
    %10 = arith.divf %8, %9 : vector<8x128xf32>
    %c0_6 = arith.constant 0 : index
    %c0_7 = arith.constant 0 : index
    %11 = vector.load %arg4[%c0_6, %c0_7] : memref<128x128xf32, #tpu.memory_space<vmem>>, vector<128x128xf32>
    %cst_8 = arith.constant dense<0.000000e+00> : vector<8x128xf32>
    %12 = tpu.matmul %10, %11, %cst_8 {dimension_numbers = #tpu.dot_dimension_numbers<[1], [0], [0], [1], [0, 0, 1, 1], [], []>} : vector<8x128xf32>, vector<128x128xf32>, vector<8x128xf32> -> vector<8x128xf32>
    %c0_9 = arith.constant 0 : index
    %c0_10 = arith.constant 0 : index
    %13 = vector.load %arg5[%c0_9, %c0_10] : memref<1x128xf32, #tpu.memory_space<vmem>>, vector<1x128xf32>
    %14 = vector.broadcast %13 : vector<1x128xf32> to vector<8x128xf32>
    %15 = arith.addf %12, %14 : vector<8x128xf32>
    %c0_11 = arith.constant 0 : index
    %c0_12 = arith.constant 0 : index
    %16 = vector.load %arg6[%c0_11, %c0_12] : memref<8x128xf32, #tpu.memory_space<vmem>>, vector<8x128xf32>
    tpu.vector_store %arg6[%c0_11, %c0_12], %15 {strides = array<i32>} : memref<8x128xf32, #tpu.memory_space<vmem>>, vector<8x128xf32>,
    return
  }
  func.func @transform_0(%arg0: i32) -> (i32, i32) {
    %c0_i32 = arith.constant 0 : i32
    %c0_i32_0 = arith.constant 0 : i32
    return %arg0, %c0_i32 : i32, i32
  }
  func.func @transform_1(%arg0: i32) -> (i32, i32) {
    %c0_i32 = arith.constant 0 : i32
    %c0_i32_0 = arith.constant 0 : i32
    %c0_i32_1 = arith.constant 0 : i32
    return %c0_i32, %c0_i32_0 : i32, i32
  }
  func.func @transform_2(%arg0: i32) -> (i32, i32) {
    %c0_i32 = arith.constant 0 : i32
    %c0_i32_0 = arith.constant 0 : i32
    %c0_i32_1 = arith.constant 0 : i32
    return %c0_i32, %c0_i32_0 : i32, i32
  }
  func.func @transform_3(%arg0: i32) -> (i32, i32) {
    %c0_i32 = arith.constant 0 : i32
    %c0_i32_0 = arith.constant 0 : i32
    %c0_i32_1 = arith.constant 0 : i32
    return %c0_i32, %c0_i32_0 : i32, i32
  }
  func.func @transform_4(%arg0: i32) -> (i32, i32) {
    %c0_i32 = arith.constant 0 : i32
    %c0_i32_0 = arith.constant 0 : i32
    %c0_i32_1 = arith.constant 0 : i32
    return %c0_i32, %c0_i32_0 : i32, i32
  }
  func.func @transform_5(%arg0: i32) -> (i32, i32) {
    %c0_i32 = arith.constant 0 : i32
    %c0_i32_0 = arith.constant 0 : i32
    return %arg0, %c0_i32 : i32, i32
  }
}

</mosaic_0001>

<bundles_post_ra>
// kernel: _mlp_forward.1
= control target key start
LH: loop header
LB: loop body
LE: loop exit
PB: predicated region body
PF: predicated region fallthrough
CT: control target
= control target key end

     0   :  { %10 = vsyncpa [#allocation3], 0  ;;  %s315_s0 = inlined_call_operand.vmem [shape: f32[8,128], index: 0, kind: input, shape index: {}]   ;;  %s316_s1 = inlined_call_operand.hbm [shape: f32[128,128], index: 1, kind: input, shape index: {}]   ;;  %s317_s2 = inlined_call_operand.vmem [shape: f32[1,128], index: 2, kind: input, shape index: {}]   ;;  %s318_s3 = inlined_call_operand.hbm [shape: f32[128,128], index: 3, kind: input, shape index: {}]   ;;  %s319_s4 = inlined_call_operand.vmem [shape: f32[1,128], index: 4, kind: input, shape index: {}]   ;;  %s320_s5 = inlined_call_operand.hbm [shape: f32[8,128], index: 5, kind: output, shape index: {}]  }
   0x1   :  { %11 = vsyncpa [#allocation6], 0 }
   0x2   :  { %12 = vsyncpa [#allocation4], 0  ;;  %s19_s20 = sshll.u32 %s316_s1, 4  ;;  %s262_s21 = smov [#allocation2]   ;;  %s20_s20 = int_to_ptr.hbm [resolvable:$true] %s19_s20 }
   0x3   :  { %s21_s22 = sshll.u32 %s262_s21, 4  ;;  %s34_s25 = sshll.u32 %s318_s3, 4  ;;  %s22_s22 = int_to_ptr.vmem [resolvable:$true] %s21_s22  ;;  %s35_s25 = int_to_ptr.hbm [resolvable:$true] %s34_s25 }
   0x4   :  { %s263_s26 = smov 128   ;;  %s264_s27 = smov 8  }
   0x5   :  { %27 = dma.hbm_to_vmem [thread:$0]  %s20_s20, 2048, %s22_s22, [#allocation3], %s263_s26, %s263_s26, %s264_s27  }
   0x6   :  { %s265_s28 = smov [#allocation5]  }
   0x7   :  { %s36_s29 = sshll.u32 %s265_s28, 4  ;;  %s37_s29 = int_to_ptr.vmem [resolvable:$true] %s36_s29 }
   0x8   :  { %42 = dma.hbm_to_vmem [thread:$0]  %s35_s25, 2048, %s37_s29, [#allocation6], %s263_s26, %s263_s26, %s264_s27  }
   0x9   :  { %256 = dma.done.wait [#allocation3], 2048  }
   0xa   :  { %257 = vsyncadd [#allocation3], 4294965248 }
   0xb   :  { %258 = dma.done.wait [#allocation6], 2048  }
   0xc   :  { %259 = vsyncadd [#allocation6], 4294965248  ;;  %v69_v0 = vld [vmem:[#allocation2 + $0x78] sm:$0xff]  ;;  %v68_v1 = vld [vmem:[#allocation2 + $0x70] sm:$0xff]  ;;  %s266_s7 = smov [#allocation7]   ;;  %s161_s11 = sshll.u32 %s320_s5, 4  ;;  %s162_s11 = int_to_ptr.hbm [resolvable:$true] %s161_s11 }
   0xd   :  { %74 = vmatpush.msra.mxu0 %v69_v0  ;;  %v67_v2 = vld [vmem:[#allocation2 + $0x68] sm:$0xff]  ;;  %v66_v3 = vld [vmem:[#allocation2 + $0x60] sm:$0xff]  ;;  %v65_v4 = vld [vmem:[#allocation2 + $0x58] sm:$0xff]  ;;  %s159_s8 = sshll.u32 %s266_s7, 4  ;;  %s160_s8 = int_to_ptr.vmem [resolvable:$true] %s159_s8 }
   0xe   :  { %v64_v5 = vld [vmem:[#allocation2 + $0x50] sm:$0xff]  ;;  %v63_v6 = vld [vmem:[#allocation2 + $0x48] sm:$0xff]  ;;  %v62_v7 = vld [vmem:[#allocation2 + $0x40] sm:$0xff] }
   0xf   :  { %75 = vmatpush.msra.mxu0 %v68_v1  ;;  %v61_v8 = vld [vmem:[#allocation2 + $0x38] sm:$0xff]  ;;  %v60_v9 = vld [vmem:[#allocation2 + $0x30] sm:$0xff]  ;;  %v59_v10 = vld [vmem:[#allocation2 + $0x28] sm:$0xff] }
  0x10   :  { %v58_v11 = vld [vmem:[#allocation2 + $0x20] sm:$0xff]  ;;  %v57_v12 = vld [vmem:[#allocation2 + $0x18] sm:$0xff]  ;;  %v56_v13 = vld [vmem:[#allocation2 + $0x10] sm:$0xff] }
  0x11   :  { %76 = vmatpush.msra.mxu0 %v67_v2  ;;  %v55_v14 = vld [vmem:[#allocation2 + $0x8] sm:$0xff]  ;;  %v54_v15 = vld [vmem:[#allocation2] sm:$0xff]  ;;  %v128_v17 = vld [vmem:[#allocation5 + $0x78] sm:$0xff] }
  0x12   :  { %v53_v16 = vld [vmem:[%s315_s0] sm:$0xff]  ;;  %133 = vmatpush.msra.mxu1 %v128_v17  ;;  %v127_v18 = vld [vmem:[#allocation5 + $0x70] sm:$0xff]  ;;  %v126_v19 = vld [vmem:[#allocation5 + $0x68] sm:$0xff] }
  0x13   :  { %77 = vmatpush.msra.mxu0 %v66_v3  ;;  %v125_v20 = vld [vmem:[#allocation5 + $0x60] sm:$0xff]  ;;  %v124_v21 = vld [vmem:[#allocation5 + $0x58] sm:$0xff]  ;;  %v123_v22 = vld [vmem:[#allocation5 + $0x50] sm:$0xff] }
  0x14   :  { %134 = vmatpush.msra.mxu1 %v127_v18  ;;  %v122_v23 = vld [vmem:[#allocation5 + $0x48] sm:$0xff]  ;;  %v121_v24 = vld [vmem:[#allocation5 + $0x40] sm:$0xff]  ;;  %v120_v25 = vld [vmem:[#allocation5 + $0x38] sm:$0xff] }
  0x15   :  { %78 = vmatpush.msra.mxu0 %v65_v4  ;;  %v119_v26 = vld [vmem:[#allocation5 + $0x30] sm:$0xff]  ;;  %v118_v27 = vld [vmem:[#allocation5 + $0x28] sm:$0xff]  ;;  %v117_v28 = vld [vmem:[#allocation5 + $0x20] sm:$0xff] }
  0x16   :  { %135 = vmatpush.msra.mxu1 %v126_v19  ;;  %v116_v29 = vld [vmem:[#allocation5 + $0x18] sm:$0xff]  ;;  %v115_v30 = vld [vmem:[#allocation5 + $0x10] sm:$0xff]  ;;  %v114_v31 = vld [vmem:[#allocation5 + $0x8] sm:$0xff] }
  0x17   :  { %79 = vmatpush.msra.mxu0 %v64_v5  ;;  %v113_v32 = vld [vmem:[#allocation5] sm:$0xff] }
  0x18   :  { %136 = vmatpush.msra.mxu1 %v125_v20  ;;  %v178_v33 = vld [vmem:[%s317_s2] ss:$0 sm:$0xff] }
  0x19   :  { %80 = vmatpush.msra.mxu0 %v63_v6  ;;  %v179_v49 = vld [vmem:[%s319_s4] ss:$0 sm:$0xff] }
  0x1a   :  { %137 = vmatpush.msra.mxu1 %v124_v21 }
  0x1b   :  { %81 = vmatpush.msra.mxu0 %v62_v7 }
  0x1c   :  { %138 = vmatpush.msra.mxu1 %v123_v22 }
  0x1d   :  { %82 = vmatpush.msra.mxu0 %v61_v8 }
  0x1e   :  { %139 = vmatpush.msra.mxu1 %v122_v23 }
  0x1f   :  { %83 = vmatpush.msra.mxu0 %v60_v9 }
  0x20   :  { %140 = vmatpush.msra.mxu1 %v121_v24 }
  0x21   :  { %84 = vmatpush.msra.mxu0 %v59_v10 }
  0x22   :  { %141 = vmatpush.msra.mxu1 %v120_v25 }
  0x23   :  { %85 = vmatpush.msra.mxu0 %v58_v11 }
  0x24   :  { %142 = vmatpush.msra.mxu1 %v119_v26 }
  0x25   :  { %86 = vmatpush.msra.mxu0 %v57_v12 }
  0x26   :  { %143 = vmatpush.msra.mxu1 %v118_v27 }
  0x27   :  { %87 = vmatpush.msra.mxu0 %v56_v13 }
  0x28   :  { %144 = vmatpush.msra.mxu1 %v117_v28 }
  0x29   :  { %88 = vmatpush.msra.mxu0 %v55_v14 }
  0x2a   :  { %145 = vmatpush.msra.mxu1 %v116_v29 }
  0x2b   :  { %89 = vmatpush.msra.mxu0 %v54_v15 }
  0x2c   :  { %90 = vmatmul.f32.vlgmr.msra.gmra.mxu0 %v53_v16  ;;  %146 = vmatpush.msra.mxu1 %v115_v30 }
  0x2e   :  { %147 = vmatpush.msra.mxu1 %v114_v31 }
  0x30   :  { %148 = vmatpush.msra.mxu1 %v113_v32 }
  0xa9   :  { %v91_v34 = vpop.f32.mrf.mxu0 }
  0xaa   :  { %v92_v35 = vadd.f32 %v178_v33, %v91_v34 }
  0xac   :  { %v172_v36 = vmul.f32 -1.442695, %v92_v35 }
  0xae   :  { %180 = vpow2.f32 %v172_v36 }
  0xb4   :  { %v181_v37 = vpop.eup %180 }
  0xb5   :  { %v97_v38 = vadd.f32 1.0, %v181_v37 }
  0xb7   :  { %182 = vrcp.f32 %v97_v38  ;;  %v109_v42 = vand.u32 2147483648, %v97_v38  ;;  %v107_v44 = vand.u32 2147483647, %v97_v38  ;;  %vm103_vm1 = vweird.f32 %v97_v38 }
  0xb9   :  { %v110_v46 = vor.u32 1.1754944e-38, %v109_v42  ;;  %vm108_vm3 = vcmp.eq.f32.partialorder %v107_v44, 8.507059e+37 }
  0xbd   :  { %v183_v39 = vpop.eup %182 }
  0xbe   :  { %v99_v40 = vmul.f32 %v183_v39, %v97_v38  ;;  %vm104_vm0 = vweird.f32 %v183_v39 }
  0xbf   :  { %vm105_vm2 = vmor %vm103_vm1, %vm104_vm0 }
  0xc0   :  { %v100_v41 = vsub.f32 1.0, %v99_v40 }
  0xc2   :  { %v101_v43 = vmul.f32 %v183_v39, %v100_v41 }
  0xc4   :  { %v102_v45 = vadd.f32 %v183_v39, %v101_v43 }
  0xc6   :  { %v106_v47 = vsel %vm105_vm2, %v183_v39, %v102_v45 }
  0xc7   :  { %v111_v48 = vsel %vm108_vm3, %v110_v46, %v106_v47 }
  0xc8   :  { %149 = vmatmul.f32.vlgmr.msra.gmra.mxu1 %v111_v48 }
 0x145   :  { %v150_v50 = vpop.f32.mrf.mxu1 }
 0x146   :  { %v151_v51 = vadd.f32 %v179_v49, %v150_v50 }
 0x148   :  { %153 = vst [vmem:[#allocation7] sm:$0xff] %v151_v51 }
 0x149   :  { %164 = dma.vmem_to_hbm [thread:$0]  %s160_s8, 128, %s162_s11, [#allocation4]  }
 0x14a   :  { %260 = dma.done.wait [#allocation4], 128  }
 0x14b   :  { %261 = vsyncadd [#allocation4], 4294967168 }
 0x14c   :  { %169 = vsyncpa [#allocation3], 1 }
 0x14d   :  { %170 = vsyncpa [#allocation6], 1 }
 0x14e   :  { %171 = vsyncpa [#allocation4], 1 }

</bundles_post_ra>
